<compile_context>
chip_gen: v6e
topology: v6e:2x2x1
jax: 0.10.0
libtpu: 0.0.40
codegen_flags: <defaults>
</compile_context>

<pallas_src>
import functools

import jax
import jax.numpy as jnp
from jax.experimental import pallas as pl
from jax.experimental.pallas import tpu as pltpu


def _round_up(x, m):
    return (x + m - 1) // m * m


def _ffn_kernel(x_ref, w1_ref, b1_ref, w2_ref, b2_ref, o_ref, acc_ref, *,
                activation):
    # x_ref : (tm, d_model)      w1_ref: (d_model, tf)   b1_ref: (1, tf)
    # w2_ref: (tf, d_model)      b2_ref: (1, d_model)
    # o_ref : (tm, d_model)      acc_ref: (tm, d_model) f32 scratch (resident)
    f = pl.program_id(1)

    @pl.when(f == 0)
    def _():
        acc_ref[...] = jnp.zeros_like(acc_ref)

    # linear1 tile: native-dtype MXU operands, f32 accumulation.
    h = jnp.dot(x_ref[...], w1_ref[...], preferred_element_type=jnp.float32)
    h = h + b1_ref[...].astype(jnp.float32)          # broadcast (1, tf)
    if activation == "relu":
        h = jnp.maximum(h, 0.0)
    else:  # gelu
        h = jax.nn.gelu(h)

    # dropout(p=0.0) is the identity.
    # TODO(synk): non-zero dropout would need pltpu.prng_seed/prng_random_bits masking.

    # linear2 tile accumulated into the resident f32 accumulator.
    acc_ref[...] += jnp.dot(h.astype(w2_ref.dtype), w2_ref[...],
                            preferred_element_type=jnp.float32)

    @pl.when(f == pl.num_programs(1) - 1)
    def _():
        o_ref[...] = (acc_ref[...]
                      + b2_ref[...].astype(jnp.float32)).astype(o_ref.dtype)


@functools.partial(jax.jit, static_argnames=("tm", "tf", "activation"))
def feed_forward(x, w1, b1, w2, b2, *, tm=256, tf=512, activation="relu"):
    """x: (n_tokens, d_model). Weights pre-transposed: w1 (d_model, dim_ff),
    w2 (dim_ff, d_model). Biases 2-D: b1 (1, dim_ff), b2 (1, d_model)."""
    n_tok, d_model = x.shape
    dim_ff = w1.shape[1]

    # Clamp tile sizes to the problem (shapes are static under jit).
    tm = min(tm, _round_up(n_tok, 8))
    tf = min(tf, dim_ff)
    assert dim_ff % tf == 0, "dim_ff must be divisible by the ff tile size"
    assert d_model % 128 == 0 and tf % 128 == 0, \
        "lane dims (d_model, ff tile) must be multiples of 128"

    # Ragged token counts: pad to a multiple of tm, slice off afterwards.
    n_pad = _round_up(n_tok, tm)
    if n_pad != n_tok:
        x = jnp.pad(x, ((0, n_pad - n_tok), (0, 0)))

    grid = (n_pad // tm, dim_ff // tf)

    itemsize = jnp.dtype(x.dtype).itemsize
    # Rough double-buffered VMEM footprint (+ f32 accumulator), with headroom;
    # kept under v7x's 64 MiB for the default tile sizes.
    vmem_bytes = (2 * itemsize * (2 * tm * d_model            # x + out tiles
                                  + d_model * tf + tf         # W1 tile + b1
                                  + tf * d_model + d_model)   # W2 tile + b2
                  + 4 * tm * d_model)                         # f32 accumulator
    vmem_limit = int(min(max(2 * vmem_bytes, 32 << 20), 100 << 20))

    flops = 2 * n_pad * d_model * dim_ff * 2                  # two matmuls
    bytes_accessed = itemsize * (2 * n_pad * d_model          # x + out
                                 + 2 * d_model * dim_ff       # W1 + W2
                                 + dim_ff + d_model)          # biases

    out = pl.pallas_call(
        functools.partial(_ffn_kernel, activation=activation),
        out_shape=jax.ShapeDtypeStruct((n_pad, d_model), x.dtype),
        grid_spec=pltpu.PrefetchScalarGridSpec(
            num_scalar_prefetch=0,
            grid=grid,
            in_specs=[
                pl.BlockSpec((tm, d_model), lambda i, f: (i, 0)),   # x tile
                pl.BlockSpec((d_model, tf), lambda i, f: (0, f)),   # W1 ff-slice
                pl.BlockSpec((1, tf), lambda i, f: (0, f)),         # b1 ff-slice
                pl.BlockSpec((tf, d_model), lambda i, f: (f, 0)),   # W2 ff-slice
                pl.BlockSpec((1, d_model), lambda i, f: (0, 0)),    # b2 (resident)
            ],
            out_specs=pl.BlockSpec((tm, d_model), lambda i, f: (i, 0)),
            scratch_shapes=[pltpu.VMEM((tm, d_model), jnp.float32)],
        ),
        compiler_params=pltpu.CompilerParams(
            dimension_semantics=("parallel", "arbitrary"),
            vmem_limit_bytes=vmem_limit),
        cost_estimate=pl.CostEstimate(
            flops=flops,
            transcendentals=0 if activation == "relu" else n_pad * dim_ff,
            bytes_accessed=bytes_accessed),
    )(x, w1, b1, w2, b2)

    if n_pad != n_tok:
        out = out[:n_tok]
    return out


def feed_forward_ref(x, w1, b1, w2, b2):
    h = jnp.maximum(x @ w1 + b1, 0.0)
    return h @ w2 + b2


if __name__ == "__main__":
    # Small shapes consistent with the module (d_model / dim_ff scaled down,
    # but lane-dense: last dims are multiples of 128).
    batch, seq, d_model, dim_ff = 2, 8, 128, 256

    key = jax.random.PRNGKey(0)
    kx, kw1, kb1, kw2, kb2 = jax.random.split(key, 5)

    x = jax.random.normal(kx, (batch, seq, d_model), dtype=jnp.float32)

    # nn.Linear-style init (uniform in +-1/sqrt(fan_in)), deterministic.
    lim1 = 1.0 / jnp.sqrt(d_model)
    lim2 = 1.0 / jnp.sqrt(dim_ff)
    # Stored already transposed to [in, out] for x @ W.
    w1 = jax.random.uniform(kw1, (d_model, dim_ff), jnp.float32, -lim1, lim1)
    b1 = jax.random.uniform(kb1, (1, dim_ff), jnp.float32, -lim1, lim1)
    w2 = jax.random.uniform(kw2, (dim_ff, d_model), jnp.float32, -lim2, lim2)
    b2 = jax.random.uniform(kb2, (1, d_model), jnp.float32, -lim2, lim2)

    x2d = x.reshape(batch * seq, d_model)          # flatten leading dims (glue)
    out2d = feed_forward(x2d, w1, b1, w2, b2, activation="relu")
    out = out2d.reshape(batch, seq, d_model)
    jax.block_until_ready(out)

    ref = feed_forward_ref(x2d, w1, b1, w2, b2).reshape(batch, seq, d_model)
    assert out.shape == ref.shape
    assert jnp.allclose(out, ref, atol=1e-4, rtol=1e-4), "mismatch vs reference"

    print("KERNEL_OK")
</pallas_src>

<mosaic_0001>
module attributes {stable_mosaic.version = 11 : i64} {
  func.func @_ffn_kernel(%arg0: i32, %arg1: i32, %arg2: memref<16x128xf32, #tpu.memory_space<vmem>>, %arg3: memref<128x256xf32, #tpu.memory_space<vmem>>, %arg4: memref<1x256xf32, #tpu.memory_space<vmem>>, %arg5: memref<256x128xf32, #tpu.memory_space<vmem>>, %arg6: memref<1x128xf32, #tpu.memory_space<vmem>>, %arg7: memref<16x128xf32, #tpu.memory_space<vmem>>, %arg8: memref<16x128xf32, #tpu.memory_space<vmem>>) attributes {dimension_semantics = [#tpu.dimension_semantics<parallel>, #tpu.dimension_semantics<arbitrary>], iteration_bounds = array<i64: 1, 1>, scalar_prefetch = 0 : i64, scratch_operands = 1 : i64, tpu.core_type = #tpu.core_type<tc>, window_params = [{transform_indices = @transform_0, window_bounds = array<i64: 16, 128>}, {transform_indices = @transform_1, window_bounds = array<i64: 128, 256>}, {transform_indices = @transform_2, window_bounds = array<i64: 1, 256>}, {transform_indices = @transform_3, window_bounds = array<i64: 256, 128>}, {pipeline_mode = #tpu.pipeline_mode<synchronous>, transform_indices = @transform_4, window_bounds = array<i64: 1, 128>}, {transform_indices = @transform_5, window_bounds = array<i64: 16, 128>}]} {
    %c0_i32 = arith.constant 0 : i32
    %0 = arith.cmpi eq, %arg1, %c0_i32 : i32
    %1 = arith.extui %0 : i1 to i32
    %c0_i32_0 = arith.constant 0 : i32
    %2 = arith.cmpi ne, %1, %c0_i32_0 : i32
    scf.if %2 {
      %cst_16 = arith.constant 0.000000e+00 : f32
      %19 = vector.broadcast %cst_16 : f32 to vector<16x128xf32>
      %c0_17 = arith.constant 0 : index
      %c0_18 = arith.constant 0 : index
      %20 = vector.load %arg8[%c0_17, %c0_18] : memref<16x128xf32, #tpu.memory_space<vmem>>, vector<16x128xf32>
      tpu.vector_store %arg8[%c0_17, %c0_18], %19 {strides = array<i32>} : memref<16x128xf32, #tpu.memory_space<vmem>>, vector<16x128xf32>,
    } else {
    }
    %c0 = arith.constant 0 : index
    %c0_1 = arith.constant 0 : index
    %3 = vector.load %arg2[%c0, %c0_1] : memref<16x128xf32, #tpu.memory_space<vmem>>, vector<16x128xf32>
    %c0_2 = arith.constant 0 : index
    %c0_3 = arith.constant 0 : index
    %4 = vector.load %arg3[%c0_2, %c0_3] : memref<128x256xf32, #tpu.memory_space<vmem>>, vector<128x256xf32>
    %cst = arith.constant dense<0.000000e+00> : vector<16x256xf32>
    %5 = tpu.matmul %3, %4, %cst {dimension_numbers = #tpu.dot_dimension_numbers<[1], [0], [0], [1], [0, 0, 1, 1], [], []>} : vector<16x128xf32>, vector<128x256xf32>, vector<16x256xf32> -> vector<16x256xf32>
    %c0_4 = arith.constant 0 : index
    %c0_5 = arith.constant 0 : index
    %6 = vector.load %arg4[%c0_4, %c0_5] : memref<1x256xf32, #tpu.memory_space<vmem>>, vector<1x256xf32>
    %7 = vector.broadcast %6 : vector<1x256xf32> to vector<16x256xf32>
    %8 = arith.addf %5, %7 : vector<16x256xf32>
    %cst_6 = arith.constant 0.000000e+00 : f32
    %9 = vector.broadcast %cst_6 : f32 to vector<16x256xf32>
    %10 = arith.maximumf %8, %9 : vector<16x256xf32>
    %c0_7 = arith.constant 0 : index
    %c0_8 = arith.constant 0 : index
    %11 = vector.load %arg8[%c0_7, %c0_8] : memref<16x128xf32, #tpu.memory_space<vmem>>, vector<16x128xf32>
    %c0_9 = arith.constant 0 : index
    %c0_10 = arith.constant 0 : index
    %12 = vector.load %arg5[%c0_9, %c0_10] : memref<256x128xf32, #tpu.memory_space<vmem>>, vector<256x128xf32>
    %cst_11 = arith.constant dense<0.000000e+00> : vector<16x128xf32>
    %13 = tpu.matmul %10, %12, %cst_11 {dimension_numbers = #tpu.dot_dimension_numbers<[1], [0], [0], [1], [0, 0, 1, 1], [], []>} : vector<16x256xf32>, vector<256x128xf32>, vector<16x128xf32> -> vector<16x128xf32>
    %14 = arith.addf %11, %13 : vector<16x128xf32>
    %c0_12 = arith.constant 0 : index
    %c0_13 = arith.constant 0 : index
    %15 = vector.load %arg8[%c0_12, %c0_13] : memref<16x128xf32, #tpu.memory_space<vmem>>, vector<16x128xf32>
    tpu.vector_store %arg8[%c0_12, %c0_13], %14 {strides = array<i32>} : memref<16x128xf32, #tpu.memory_space<vmem>>, vector<16x128xf32>,
    %c0_i32_14 = arith.constant 0 : i32
    %16 = arith.cmpi eq, %arg1, %c0_i32_14 : i32
    %17 = arith.extui %16 : i1 to i32
    %c0_i32_15 = arith.constant 0 : i32
    %18 = arith.cmpi ne, %17, %c0_i32_15 : i32
    scf.if %18 {
      %c0_16 = arith.constant 0 : index
      %c0_17 = arith.constant 0 : index
      %19 = vector.load %arg8[%c0_16, %c0_17] : memref<16x128xf32, #tpu.memory_space<vmem>>, vector<16x128xf32>
      %c0_18 = arith.constant 0 : index
      %c0_19 = arith.constant 0 : index
      %20 = vector.load %arg6[%c0_18, %c0_19] : memref<1x128xf32, #tpu.memory_space<vmem>>, vector<1x128xf32>
      %21 = vector.broadcast %20 : vector<1x128xf32> to vector<16x128xf32>
      %22 = arith.addf %19, %21 : vector<16x128xf32>
      %c0_20 = arith.constant 0 : index
      %c0_21 = arith.constant 0 : index
      %23 = vector.load %arg7[%c0_20, %c0_21] : memref<16x128xf32, #tpu.memory_space<vmem>>, vector<16x128xf32>
      tpu.vector_store %arg7[%c0_20, %c0_21], %22 {strides = array<i32>} : memref<16x128xf32, #tpu.memory_space<vmem>>, vector<16x128xf32>,
    } else {
    }
    return
  }
  func.func @transform_0(%arg0: i32, %arg1: i32) -> (i32, i32) {
    %c0_i32 = arith.constant 0 : i32
    %c0_i32_0 = arith.constant 0 : i32
    return %arg0, %c0_i32 : i32, i32
  }
  func.func @transform_1(%arg0: i32, %arg1: i32) -> (i32, i32) {
    %c0_i32 = arith.constant 0 : i32
    %c0_i32_0 = arith.constant 0 : i32
    return %c0_i32, %arg1 : i32, i32
  }
  func.func @transform_2(%arg0: i32, %arg1: i32) -> (i32, i32) {
    %c0_i32 = arith.constant 0 : i32
    %c0_i32_0 = arith.constant 0 : i32
    return %c0_i32, %arg1 : i32, i32
  }
  func.func @transform_3(%arg0: i32, %arg1: i32) -> (i32, i32) {
    %c0_i32 = arith.constant 0 : i32
    %c0_i32_0 = arith.constant 0 : i32
    return %arg1, %c0_i32 : i32, i32
  }
  func.func @transform_4(%arg0: i32, %arg1: i32) -> (i32, i32) {
    %c0_i32 = arith.constant 0 : i32
    %c0_i32_0 = arith.constant 0 : i32
    %c0_i32_1 = arith.constant 0 : i32
    return %c0_i32, %c0_i32_0 : i32, i32
  }
  func.func @transform_5(%arg0: i32, %arg1: i32) -> (i32, i32) {
    %c0_i32 = arith.constant 0 : i32
    %c0_i32_0 = arith.constant 0 : i32
    return %arg0, %c0_i32 : i32, i32
  }
}

</mosaic_0001>

<bundles_post_ra>
// kernel: feed_forward.1
= control target key start
LH: loop header
LB: loop body
LE: loop exit
PB: predicated region body
PF: predicated region fallthrough
CT: control target
= control target key end

     0   :  { %10 = vsyncpa [#allocation4], 0  ;;  %s544_s0 = inlined_call_operand.hbm [shape: f32[16,128], index: 0, kind: input, shape index: {}]   ;;  %s545_s1 = inlined_call_operand.hbm [shape: f32[128,256], index: 1, kind: input, shape index: {}]   ;;  %s546_s2 = inlined_call_operand.vmem [shape: f32[1,256], index: 2, kind: input, shape index: {}]   ;;  %s547_s3 = inlined_call_operand.hbm [shape: f32[256,128], index: 3, kind: input, shape index: {}]   ;;  %s548_s4 = inlined_call_operand.vmem [shape: f32[1,128], index: 4, kind: input, shape index: {}]   ;;  %s549_s5 = inlined_call_operand.hbm [shape: f32[16,128], index: 5, kind: output, shape index: {}]  }
   0x1   :  { %11 = vsyncpa [#allocation7], 0 }
   0x2   :  { %12 = vsyncpa [#allocation5], 0  ;;  %s476_s18 = smov [#allocation6]  }
   0x3   :  { %s30_s19 = sshll.u32 %s476_s18, 4  ;;  %s31_s19 = int_to_ptr.vmem [resolvable:$true] %s30_s19 }
   0x4   :  { %s398_s20 = scalar_lea.vmem %s31_s19, 4096  ;;  %p403_p1 = scmp.lt.s32.totalorder %s31_s19, %s31_s19 }
   0x5   :  { %p399_p0 = scmp.ne.s32.totalorder %s31_s19, %s398_s20  ;;  %p404_p2 = scmp.lt.s32.totalorder %s398_s20, %s398_s20 }
   0x7   :  { %p405_p3 = por %p404_p2, %p403_p1 }
   0x9   :  { %p406_p4 = pnand %p405_p3, %p399_p0 }
   0xb   :  { %409 = shalt.err (!%p406_p4)
}
   0xc   :  { %s477_s21 = smov 256   ;;  %s478_s22 = smov 16  }
   0xd   :  { %36 = dma.hbm_to_vmem [thread:$0]  %s545_s1, 4096, %s31_s19, [#allocation7], %s477_s21, %s477_s21, %s478_s22  }
   0xe   :  { %s479_s25 = smov [#allocation3]  }
   0xf   :  { %s18_s26 = sshll.u32 %s479_s25, 4  ;;  %s19_s26 = int_to_ptr.vmem [resolvable:$true] %s18_s26 }
  0x10   :  { %s418_s27 = scalar_lea.vmem %s19_s26, 256  ;;  %p423_p6 = scmp.lt.s32.totalorder %s19_s26, %s19_s26 }
  0x11   :  { %p419_p5 = scmp.ne.s32.totalorder %s19_s26, %s418_s27  ;;  %p424_p7 = scmp.lt.s32.totalorder %s418_s27, %s418_s27 }
  0x13   :  { %p425_p8 = por %p424_p7, %p423_p6 }
  0x15   :  { %p426_p9 = pnand %p425_p8, %p419_p5 }
  0x17   :  { %429 = shalt.err (!%p426_p9)
}
  0x18   :  { %s480_s28 = smov 128   ;;  %s481_s29 = smov 8  }
  0x19   :  { %24 = dma.hbm_to_vmem [thread:$0]  %s544_s0, 256, %s19_s26, [#allocation4], %s480_s28, %s480_s28, %s481_s29  }
  0x1a   :  { %s482_s1 = smov [#allocation8]  }
  0x1b   :  { %s44_s7 = sshll.u32 %s482_s1, 4  ;;  %s45_s7 = int_to_ptr.vmem [resolvable:$true] %s44_s7 }
  0x1c   :  { %s438_s8 = scalar_lea.vmem %s45_s7, 4096  ;;  %p443_p11 = scmp.lt.s32.totalorder %s45_s7, %s45_s7 }
  0x1d   :  { %p439_p10 = scmp.ne.s32.totalorder %s45_s7, %s438_s8  ;;  %p444_p12 = scmp.lt.s32.totalorder %s438_s8, %s438_s8 }
  0x1f   :  { %p445_p13 = por %p444_p12, %p443_p11 }
  0x21   :  { %p446_p0 = pnand %p445_p13, %p439_p10 }
  0x23   :  { %449 = shalt.err (!%p446_p0)
}
  0x24   :  { %50 = dma.hbm_to_vmem [thread:$0]  %s547_s3, 4096, %s45_s7, [#allocation7], %s480_s28, %s480_s28, %s481_s29  }
  0x25   :  { %470 = dma.done.wait [#allocation4], 256  }
  0x26   :  { %471 = vsyncadd [#allocation4], 4294967040 }
  0x27   :  { %472 = dma.done.wait [#allocation7], 8192  }
  0x28   :  { %473 = vsyncadd [#allocation7], 4294959104  ;;  %v483_v0 = vmov 0.0   ;;  %v101_v1 = vld [vmem:[#allocation6 + $0xf8] sm:$0xff]  ;;  %v100_v2 = vld [vmem:[#allocation6 + $0xf0] sm:$0xff]  ;;  %s484_s12 = smov [#allocation9]  }
  0x29   :  { %178 = vmatprep.mubr.f32.mxu0 %v483_v0  ;;  %v99_v3 = vld [vmem:[#allocation6 + $0xe8] sm:$0xff]  ;;  %114 = vmatprep.subr.mxu0 %v101_v1  ;;  %v98_v4 = vld [vmem:[#allocation6 + $0xe0] sm:$0xff]  ;;  %v97_v5 = vld [vmem:[#allocation6 + $0xd8] sm:$0xff]  ;;  %s329_s13 = sshll.u32 %s484_s12, 4  ;;  %s330_s13 = int_to_ptr.vmem [resolvable:$true] %s329_s13 }
  0x2a   :  { %115 = vmatpush1.msra.mxu0 %v100_v2  ;;  %v96_v6 = vld [vmem:[#allocation6 + $0xd0] sm:$0xff]  ;;  %v95_v7 = vld [vmem:[#allocation6 + $0xc8] sm:$0xff]  ;;  %v94_v8 = vld [vmem:[#allocation6 + $0xc0] sm:$0xff]  ;;  %s450_s14 = scalar_lea.vmem %s330_s13, 256  ;;  %p455_p2 = scmp.lt.s32.totalorder %s330_s13, %s330_s13 }
  0x2b   :  { %116 = vmatprep.subr.mxu0 %v99_v3  ;;  %v93_v9 = vld [vmem:[#allocation6 + $0xb8] sm:$0xff]  ;;  %v92_v10 = vld [vmem:[#allocation6 + $0xb0] sm:$0xff]  ;;  %v91_v11 = vld [vmem:[#allocation6 + $0xa8] sm:$0xff]  ;;  %p451_p1 = scmp.ne.s32.totalorder %s330_s13, %s450_s14  ;;  %p456_p3 = scmp.lt.s32.totalorder %s450_s14, %s450_s14 }
  0x2c   :  { %117 = vmatpush1.msra.mxu0 %v98_v4  ;;  %v90_v12 = vld [vmem:[#allocation6 + $0xa0] sm:$0xff]  ;;  %v89_v13 = vld [vmem:[#allocation6 + $0x98] sm:$0xff]  ;;  %v88_v14 = vld [vmem:[#allocation6 + $0x90] sm:$0xff] }
  0x2d   :  { %118 = vmatprep.subr.mxu0 %v97_v5  ;;  %v228_v15 = vld [vmem:[#allocation8 + $0xf8] sm:$0xff]  ;;  %v87_v17 = vld [vmem:[#allocation6 + $0x88] sm:$0xff]  ;;  %v227_v18 = vld [vmem:[#allocation8 + $0xf0] sm:$0xff]  ;;  %p457_p4 = por %p456_p3, %p455_p2 }
  0x2e   :  { %119 = vmatpush1.msra.mxu0 %v96_v6  ;;  %v212_v16 = vld [vmem:[#allocation8 + $0x78] sm:$0xff]  ;;  %343 = vmatprep.subr.mxu1 %v228_v15  ;;  %v211_v19 = vld [vmem:[#allocation8 + $0x70] sm:$0xff]  ;;  %v86_v20 = vld [vmem:[#allocation6 + $0x80] sm:$0xff] }
  0x2f   :  { %120 = vmatprep.subr.mxu0 %v95_v7  ;;  %344 = vmatpush3.msra.mxu1 %v212_v16  ;;  %v226_v21 = vld [vmem:[#allocation8 + $0xe8] sm:$0xff]  ;;  %v85_v22 = vld [vmem:[#allocation6 + $0x78] sm:$0xff]  ;;  %v84_v24 = vld [vmem:[#allocation6 + $0x70] sm:$0xff]  ;;  %p458_p5 = pnand %p457_p4, %p451_p1 }
  0x30   :  { %121 = vmatpush1.msra.mxu0 %v94_v8  ;;  %345 = vmatprep.subr.mxu1 %v227_v18  ;;  %v210_v23 = vld [vmem:[#allocation8 + $0x68] sm:$0xff]  ;;  %v225_v25 = vld [vmem:[#allocation8 + $0xe0] sm:$0xff]  ;;  %v224_v29 = vld [vmem:[#allocation8 + $0xd8] sm:$0xff] }
  0x31   :  { %122 = vmatprep.subr.mxu0 %v93_v9  ;;  %346 = vmatpush3.msra.mxu1 %v211_v19  ;;  %v83_v26 = vld [vmem:[#allocation6 + $0x68] sm:$0xff]  ;;  %v209_v27 = vld [vmem:[#allocation8 + $0x60] sm:$0xff]  ;;  %v81_v30 = vld [vmem:[#allocation6 + $0x58] sm:$0xff] }
  0x32   :  { %123 = vmatpush1.msra.mxu0 %v92_v10  ;;  %347 = vmatprep.subr.mxu1 %v226_v21  ;;  %v82_v28 = vld [vmem:[#allocation6 + $0x60] sm:$0xff]  ;;  %v208_v31 = vld [vmem:[#allocation8 + $0x58] sm:$0xff]  ;;  %v80_v32 = vld [vmem:[#allocation6 + $0x50] sm:$0xff] }
  0x33   :  { %124 = vmatprep.subr.mxu0 %v91_v11  ;;  %348 = vmatpush3.msra.mxu1 %v210_v23  ;;  %v223_v33 = vld [vmem:[#allocation8 + $0xd0] sm:$0xff]  ;;  %v79_v34 = vld [vmem:[#allocation6 + $0x48] sm:$0xff]  ;;  %v78_v36 = vld [vmem:[#allocation6 + $0x40] sm:$0xff] }
  0x34   :  { %125 = vmatpush1.msra.mxu0 %v90_v12  ;;  %349 = vmatprep.subr.mxu1 %v225_v25  ;;  %v207_v35 = vld [vmem:[#allocation8 + $0x50] sm:$0xff]  ;;  %v222_v37 = vld [vmem:[#allocation8 + $0xc8] sm:$0xff]  ;;  %v77_v38 = vld [vmem:[#allocation6 + $0x38] sm:$0xff] }
  0x35   :  { %126 = vmatprep.subr.mxu0 %v89_v13  ;;  %350 = vmatpush3.msra.mxu1 %v209_v27  ;;  %v206_v39 = vld [vmem:[#allocation8 + $0x48] sm:$0xff]  ;;  %v76_v40 = vld [vmem:[#allocation6 + $0x30] sm:$0xff]  ;;  %v221_v41 = vld [vmem:[#allocation8 + $0xc0] sm:$0xff] }
  0x36   :  { %127 = vmatpush1.msra.mxu0 %v88_v14  ;;  %351 = vmatprep.subr.mxu1 %v224_v29  ;;  %v75_v42 = vld [vmem:[#allocation6 + $0x28] sm:$0xff]  ;;  %v205_v43 = vld [vmem:[#allocation8 + $0x40] sm:$0xff]  ;;  %v220_v45 = vld [vmem:[#allocation8 + $0xb8] sm:$0xff] }
  0x37   :  { %128 = vmatprep.subr.mxu0 %v87_v17  ;;  %352 = vmatpush3.msra.mxu1 %v208_v31  ;;  %v74_v44 = vld [vmem:[#allocation6 + $0x20] sm:$0xff]  ;;  %v73_v46 = vld [vmem:[#allocation6 + $0x18] sm:$0xff]  ;;  %v72_v48 = vld [vmem:[#allocation6 + $0x10] sm:$0xff] }
  0x38   :  { %129 = vmatpush1.msra.mxu0 %v86_v20  ;;  %353 = vmatprep.subr.mxu1 %v223_v33  ;;  %v204_v47 = vld [vmem:[#allocation8 + $0x38] sm:$0xff]  ;;  %v219_v49 = vld [vmem:[#allocation8 + $0xb0] sm:$0xff]  ;;  %v71_v50 = vld [vmem:[#allocation6 + $0x8] sm:$0xff] }
  0x39   :  { %130 = vmatprep.subr.mxu0 %v85_v22  ;;  %354 = vmatpush3.msra.mxu1 %v207_v35  ;;  %v203_v51 = vld [vmem:[#allocation8 + $0x30] sm:$0xff]  ;;  %v70_v52 = vld [vmem:[#allocation6] sm:$0xff]  ;;  %v218_v53 = vld [vmem:[#allocation8 + $0xa8] sm:$0xff] }
  0x3a   :  { %131 = vmatpush1.msra.mxu0 %v84_v24  ;;  %355 = vmatprep.subr.mxu1 %v222_v37  ;;  %v68_v54 = vld [vmem:[#allocation3] sm:$0xff]  ;;  %v202_v55 = vld [vmem:[#allocation8 + $0x28] sm:$0xff]  ;;  %v217_v56 = vld [vmem:[#allocation8 + $0xa0] sm:$0xff] }
  0x3b   :  { %132 = vmatprep.subr.mxu0 %v83_v26  ;;  %356 = vmatpush3.msra.mxu1 %v206_v39  ;;  %v201_v57 = vld [vmem:[#allocation8 + $0x20] sm:$0xff]  ;;  %v69_v58 = vld [vmem:[#allocation3 + $0x8] sm:$0xff]  ;;  %v215_v61 = vld [vmem:[#allocation8 + $0x90] sm:$0xff] }
  0x3c   :  { %133 = vmatpush1.msra.mxu0 %v82_v28  ;;  %357 = vmatprep.subr.mxu1 %v221_v41  ;;  %v216_v59 = vld [vmem:[#allocation8 + $0x98] sm:$0xff]  ;;  %v199_v62 = vld [vmem:[#allocation8 + $0x10] sm:$0xff]  ;;  %v214_v63 = vld [vmem:[#allocation8 + $0x88] sm:$0xff] }
  0x3d   :  { %134 = vmatprep.subr.mxu0 %v81_v30  ;;  %358 = vmatpush3.msra.mxu1 %v205_v43  ;;  %v200_v60 = vld [vmem:[#allocation8 + $0x18] sm:$0xff]  ;;  %v198_v1 = vld [vmem:[#allocation8 + $0x8] sm:$0xff]  ;;  %v213_v2 = vld [vmem:[#allocation8 + $0x80] sm:$0xff] }
  0x3e   :  { %135 = vmatpush1.msra.mxu0 %v80_v32  ;;  %359 = vmatprep.subr.mxu1 %v220_v45  ;;  %v197_v3 = vld [vmem:[#allocation8] sm:$0xff]  ;;  %v102_v6 = vld [vmem:[%s546_s2] sm:$0x3] }
  0x3f   :  { %136 = vmatprep.subr.mxu0 %v79_v34  ;;  %360 = vmatpush3.msra.mxu1 %v204_v47  ;;  %v342_v24 = vld [vmem:[%s548_s4] ss:$0 sm:$0xff] }
  0x40   :  { %137 = vmatpush1.msra.mxu0 %v78_v36  ;;  %361 = vmatprep.subr.mxu1 %v219_v49 }
  0x41   :  { %138 = vmatprep.subr.mxu0 %v77_v38  ;;  %362 = vmatpush3.msra.mxu1 %v203_v51 }
  0x42   :  { %139 = vmatpush1.msra.mxu0 %v76_v40  ;;  %363 = vmatprep.subr.mxu1 %v218_v53 }
  0x43   :  { %140 = vmatprep.subr.mxu0 %v75_v42  ;;  %364 = vmatpush3.msra.mxu1 %v202_v55 }
  0x44   :  { %141 = vmatpush1.msra.mxu0 %v74_v44  ;;  %365 = vmatprep.subr.mxu1 %v217_v56 }
  0x45   :  { %142 = vmatprep.subr.mxu0 %v73_v46  ;;  %366 = vmatpush3.msra.mxu1 %v201_v57 }
  0x46   :  { %143 = vmatpush1.msra.mxu0 %v72_v48  ;;  %367 = vmatprep.subr.mxu1 %v216_v59 }
  0x47   :  { %144 = vmatprep.subr.mxu0 %v71_v50  ;;  %368 = vmatpush3.msra.mxu1 %v200_v60 }
  0x48   :  { %145 = vmatpush1.msra.mxu0 %v70_v52  ;;  %369 = vmatprep.subr.mxu1 %v215_v61 }
  0x49   :  { %179 = vmatmul.mubr.f32.vlgmr.msra.gmra.mxu0 %v68_v54  ;;  %370 = vmatpush3.msra.mxu1 %v199_v62 }
  0x4a   :  { %184 = vmatprep.mubr.f32.mxu0 %v483_v0  ;;  %371 = vmatprep.subr.mxu1 %v214_v63  ;;  %v104_v0 = vlaneseq }
  0x4b   :  { %372 = vmatpush3.msra.mxu1 %v198_v1 }
  0x4c   :  { %373 = vmatprep.subr.mxu1 %v213_v2  ;;  %v105_v4 = vshrl.u32 %v104_v0, 7 }
  0x4d   :  { %185 = vmatmul.mubr.f32.gmra.mxu0 %v69_v58  ;;  %374 = vmatpush3.msra.mxu1 %v197_v3 }
  0x4e   :  { %v106_v5 = vsub.s32 0, %v105_v4  ;;  %v110_v7 = vsub.s32 1, %v105_v4 }
  0x50   :  { %v107_v8 = vrot.slane %v102_v6, %v106_v5  ;;  %v111_v9 = vrot.slane %v102_v6, %v110_v7 }
 0x109   :  { %v180_v10 = vpop.f32.mrf.mxu0 }
 0x10a   :  { %v181_v11 = vadd.f32 %v180_v10, %v107_v8 }
 0x10b   :  { %v182_v12 = vpop.f32.mrf.mxu0 }
 0x10c   :  { %v183_v13 = vadd.f32 %v182_v12, %v111_v9  ;;  %v191_v16 = vmax.f32 %v181_v11, 0.0 }
 0x10d   :  { %v186_v14 = vpop.f32.mrf.mxu0 }
 0x10e   :  { %v192_v15 = vmax.f32 %v183_v13, 0.0  ;;  %v187_v17 = vadd.f32 %v186_v14, %v107_v8 }
 0x10f   :  { %v188_v18 = vpop.f32.mrf.mxu0 }
 0x110   :  { %v189_v19 = vadd.f32 %v188_v18, %v111_v9  ;;  %293 = vmatprep.mubr.f32.mxu1 %v192_v15  ;;  %v193_v21 = vmax.f32 %v187_v17, 0.0 }
 0x111   :  { %294 = vmatmul.mubr.f32.vlgmr.msra.gmra.mxu1 %v191_v16 }
 0x112   :  { %v194_v20 = vmax.f32 %v189_v19, 0.0 }
 0x114   :  { %298 = vmatprep.mubr.f32.mxu1 %v194_v20 }
 0x115   :  { %299 = vmatmul.mubr.f32.gmra.mxu1 %v193_v21 }
 0x1d1   :  { %v375_v22 = vpop.f32.mrf.mxu1 }
 0x1d3   :  { %v376_v23 = vpop.f32.mrf.mxu1 }
 0x1d4   :  { %v377_v25 = vadd.f32 %v376_v23, %v375_v22 }
 0x1d5   :  { %v378_v26 = vpop.f32.mrf.mxu1 }
 0x1d6   :  { %v320_v27 = vadd.f32 %v377_v25, %v342_v24 }
 0x1d7   :  { %v379_v28 = vpop.f32.mrf.mxu1 }
 0x1d8   :  { %322 = vst [vmem:[#allocation9] sm:$0xff] %v320_v27  ;;  %v380_v29 = vadd.f32 %v379_v28, %v378_v26 }
 0x1da   :  { %v321_v30 = vadd.f32 %v380_v29, %v342_v24 }
 0x1dc   :  { %323 = vst [vmem:[#allocation9 + $0x8] sm:$0xff] %v321_v30 }
 0x1dd   :  { %461 = shalt.err (!%p458_p5)
}
 0x1de   :  { %335 = dma.vmem_to_hbm [thread:$0]  %s330_s13, 256, %s549_s5, [#allocation5], %s480_s28, %s480_s28, %s481_s29  }
 0x1df   :  { %474 = dma.done.wait [#allocation5], 256  }
 0x1e0   :  { %475 = vsyncadd [#allocation5], 4294967040 }
 0x1e1   :  { %339 = vsyncpa [#allocation4], 1 }
 0x1e2   :  { %340 = vsyncpa [#allocation7], 1 }
 0x1e3   :  { %341 = vsyncpa [#allocation5], 1 }

</bundles_post_ra>
